<compile_context>
chip_gen: v6e
topology: v6e:2x2x1
jax: 0.10.0
libtpu: 0.0.40
codegen_flags: <defaults>
</compile_context>

<pallas_src>
import math

import jax
import jax.numpy as jnp
from jax.experimental import pallas as pl
from jax.experimental.pallas import tpu as pltpu


# ----------------------------- Pallas kernels ------------------------------

def _vmem_copy_kernel(x_ref, o_ref):
    # Contiguous streaming copy: one lane-dense tile per grid step.
    o_ref[...] = x_ref[...]


def _dma_copy_kernel(x_hbm, o_hbm, sem):
    # Direct HBM -> HBM DMA of the whole buffer (no VMEM staging).
    cp = pltpu.make_async_copy(x_hbm, o_hbm, sem)
    cp.start()
    cp.wait()


# --------------------------- copy implementations ---------------------------

_TILE_BYTES = 2 << 20      # ~2 MiB tiles: 2 ops x 2 bufs => ~8 MiB resident
_VMEM_LIMIT = 32 << 20     # safe on v5e/v6e (128 MiB phys) and v7x (64 MiB phys)


def _cost(nbytes):
    # Pure copy: read + write, no flops.
    return pl.CostEstimate(flops=0, transcendentals=0, bytes_accessed=2 * nbytes)


def _sublane(itemsize):
    # Native sublane packing: f32 -> 8, bf16/f16 -> 16, int8/fp8 -> 32.
    return max(8, 32 // max(1, itemsize))


def _dma_copy(x2d):
    """Whole-buffer HBM->HBM DMA copy (any shape/dtype, no layout rules)."""
    nbytes = x2d.size * jnp.dtype(x2d.dtype).itemsize
    return pl.pallas_call(
        _dma_copy_kernel,
        out_shape=jax.ShapeDtypeStruct(x2d.shape, x2d.dtype),
        in_specs=[pl.BlockSpec(memory_space=pl.ANY)],
        out_specs=pl.BlockSpec(memory_space=pl.ANY),
        scratch_shapes=[pltpu.SemaphoreType.DMA],
        cost_estimate=_cost(nbytes),
    )(x2d)


def _vmem_copy(x):
    """Tiled lane-dense VMEM streaming copy.

    Returns None when no layout-legal lane-dense tiling exists (element count
    not a multiple of 128); the caller then uses the DMA path, which has no
    layout constraints.
    """
    total = x.size
    itemsize = jnp.dtype(x.dtype).itemsize
    sub = _sublane(itemsize)

    # Lane-dense factorization total = rows * lanes with lanes % 128 == 0
    # -> full-width unmasked vector stores (largest measured single lever).
    lanes = None
    for cand in (4096, 2048, 1024, 512, 256, 128):
        if total % cand == 0:
            lanes = cand
            break
    if lanes is None:
        return None
    rows = total // lanes

    # Rows per tile from the byte budget, aligned to the dtype sublane tile.
    tile_rows = max(sub, (_TILE_BYTES // (lanes * itemsize) // sub) * sub)
    if tile_rows >= rows:
        if rows >= 2 * sub:
            # Keep >= 2 grid steps so the "parallel" axis can shard the copy
            # across both TensorCores on v7x (neutral on v5e/v6e).
            half = (rows + 1) // 2
            tile_rows = ((half + sub - 1) // sub) * sub
        else:
            tile_rows = rows            # full row extent -> always layout-legal

    flat = x.reshape(rows, lanes)       # metadata-only flatten
    return pl.pallas_call(
        _vmem_copy_kernel,
        out_shape=jax.ShapeDtypeStruct((rows, lanes), x.dtype),
        grid_spec=pltpu.PrefetchScalarGridSpec(
            num_scalar_prefetch=0,
            grid=(pl.cdiv(rows, tile_rows),),
            in_specs=[pl.BlockSpec((tile_rows, lanes), lambda i: (i, 0))],
            out_specs=pl.BlockSpec((tile_rows, lanes), lambda i: (i, 0)),
        ),
        compiler_params=pltpu.CompilerParams(
            dimension_semantics=("parallel",),
            vmem_limit_bytes=_VMEM_LIMIT,
        ),
        cost_estimate=_cost(total * itemsize),
    )(flat)


# ------------------------------- View forward -------------------------------

def _resolve_target(feat, target_size):
    """PyTorch-style target size with at most one inferred (-1) dimension."""
    tgt = list(target_size)
    if tgt.count(-1) > 1:
        raise ValueError("only one dimension can be inferred (-1)")
    if -1 in tgt:
        known = math.prod(d for d in tgt if d != -1)
        if known == 0 or feat % known != 0:
            raise ValueError(f"cannot view {feat} features as {target_size}")
        tgt[tgt.index(-1)] = feat // known
    out_feat = math.prod(tgt) if tgt else 1
    if out_feat != feat:
        raise ValueError(
            f"cannot view input with {feat} features per batch as {target_size}")
    return tuple(tgt)


def view_forward(x, target_size, *, materialize=False, method="dma"):
    """Equivalent of View(*target_size).forward(x).

    Default (materialize=False): metadata-only reshape, zero HBM traffic —
    the fastest correct implementation on every TPU generation, since JAX
    arrays are always contiguous.  materialize=True forces the explicit copy
    kernel ("dma" = HBM->HBM DMA, "vmem" = tiled lane-dense streaming copy).
    """
    b = x.shape[0]
    feat = math.prod(x.shape[1:]) if x.ndim > 1 else 1
    tgt = _resolve_target(feat, target_size)

    if not materialize:
        # TODO(synk): torch .view aliases storage; JAX is functional, so the
        # metadata-only reshape is the closest (and fastest) equivalent.
        return x.reshape((b,) + tgt)

    if method == "vmem":
        flat = _vmem_copy(x)
        if flat is None:
            flat = _dma_copy(x.reshape(b, feat))   # layout-free fallback
    else:
        flat = _dma_copy(x.reshape(b, feat))

    return flat.reshape((b,) + tgt)                # metadata-only target view


if __name__ == "__main__":
    key = jax.random.PRNGKey(0)
    # NCHW input: batch=2, channels=4, spatial=16x16
    x = jax.random.normal(key, (2, 4, 16, 16), dtype=jnp.float32)

    # View(16, 64): reshape (2, 4, 16, 16) -> (2, 16, 64)
    target_size = (16, 64)
    ref = x.reshape((x.shape[0],) + target_size)

    # Default fast path: pure metadata reshape, no kernel, no HBM traffic.
    out_fast = jax.block_until_ready(view_forward(x, target_size))

    # Explicit materializing kernels, exercised once each.
    out_dma = jax.block_until_ready(
        view_forward(x, target_size, materialize=True, method="dma"))
    out_vmem = jax.block_until_ready(
        view_forward(x, target_size, materialize=True, method="vmem"))

    for out in (out_fast, out_dma, out_vmem):
        assert out.shape == (2, 16, 64), out.shape
        assert out.dtype == x.dtype
        assert bool(jnp.all(out == ref))

    # PyTorch-style inferred dimension (-1).
    out_inf = jax.block_until_ready(
        view_forward(x, (16, -1), materialize=True, method="dma"))
    assert out_inf.shape == (2, 16, 64)
    assert bool(jnp.all(out_inf == ref))

    print("KERNEL_OK")
</pallas_src>

<mosaic_0001>
module attributes {stable_mosaic.version = 11 : i64} {
  func.func @_dma_copy_kernel(%arg0: memref<2x1024xf32, #tpu.memory_space<any>>, %arg1: memref<2x1024xf32, #tpu.memory_space<any>>, %arg2: memref<!tpu.dma_semaphore, #tpu.memory_space<semaphore_mem>>) attributes {dimension_semantics = [], scalar_prefetch = 0 : i64, scratch_operands = 1 : i64, tpu.core_type = #tpu.core_type<tc>} {
    tpu.enqueue_dma source(%arg0 : memref<2x1024xf32, #tpu.memory_space<any>>) target(%arg1 : memref<2x1024xf32, #tpu.memory_space<any>>) target_semaphore(%arg2 : memref<!tpu.dma_semaphore, #tpu.memory_space<semaphore_mem>>)
    tpu.wait_dma2 semaphore(%arg2 : memref<!tpu.dma_semaphore, #tpu.memory_space<semaphore_mem>>) src(%arg0 : memref<2x1024xf32, #tpu.memory_space<any>>) dst(%arg1 : memref<2x1024xf32, #tpu.memory_space<any>>)
    return
  }
}

</mosaic_0001>

<bundles_post_ra>
// kernel: tpu_custom_call.1
= control target key start
LH: loop header
LB: loop body
LE: loop exit
PB: predicated region body
PF: predicated region fallthrough
CT: control target
= control target key end

     0   :  { %s29_s6 = smov [#allocation2]   ;;  %s30_s7 = smov 131072   ;;  %s48_s0 = inlined_call_operand.hbm [shape: f32[2,1024], index: 0, kind: input, shape index: {}]   ;;  %s49_s1 = inlined_call_operand.hbm [shape: f32[2,1024], index: 1, kind: output, shape index: {}]  }
   0x1   :  { %s31_s8 = smov 0  }
   0x2   :  { %12 = dma.general %s48_s0, 256, %s49_s1, %s29_s6, %s30_s7, [#allocation4], %s31_s8, 0  }
   0x3   :  { %27 = dma.done.wait [#allocation2], 256 }
   0x4   :  { %28 = vsyncadd [#allocation2], 4294967040 }
   0x5   :  { %17 = vsyncmov [#allocation2] }
   0x8   :  { %s18_s13 = vpop.sfrf %17 }
   0x9   :  { %p23_p0 = scmp.ne.s32.totalorder %s18_s13, 0 }
   0xb   :  { %22 = shalt.err (%p23_p0)  }

</bundles_post_ra>
